<compile_context>
chip_gen: v6e
topology: v6e:2x2x1
jax: 0.10.0
libtpu: 0.0.40
codegen_flags: <defaults>
</compile_context>

<pallas_src>
import functools
from typing import Optional, Tuple, Union

import jax
import jax.numpy as jnp
from jax import lax
from jax.experimental import pallas as pl
from jax.experimental.pallas import tpu as pltpu

IntOrPair = Union[int, Tuple[int, int]]


def _force_pair(v: IntOrPair) -> Tuple[int, int]:
    if isinstance(v, tuple):
        if len(v) != 2:
            raise ValueError(v)
        return int(v[0]), int(v[1])
    if isinstance(v, int):
        return v, v
    raise ValueError(v)


def _pad_value(dtype):
    """Identity element of max for this dtype (module uses -inf; ints need iinfo.min)."""
    if jnp.issubdtype(dtype, jnp.floating):
        return float("-inf")
    if jnp.issubdtype(dtype, jnp.integer):
        return int(jnp.iinfo(dtype).min)
    if jnp.issubdtype(dtype, jnp.bool_):
        return False
    raise TypeError(f"maxpool2d: unsupported dtype {dtype}")


def _vmem_limit_bytes() -> int:
    """Generation-aware scoped-VMEM limit (128 MiB parts -> ~77 MiB, v7x 64 MiB -> ~38 MiB)."""
    try:
        cap = int(pltpu.get_tpu_info().vmem_capacity_bytes)
    except Exception:
        cap = 64 * 1024 * 1024
    return max(32 * 1024 * 1024, min(int(cap * 0.6), 100 * 1024 * 1024))


def _maxpool_kernel(x_ref, o_ref, row_ref, *, kh, kw, sh, sw, ph, pw, pad_val):
    """One grid step: pool a raw (1, H, W, cb) slab into a (1, OH, OW, cb) block.

    x_ref:   (1, H, W, cb)   unpadded input, channels on lanes, W on sublanes
    o_ref:   (1, OH, OW, cb) output block
    row_ref: (W + 2*pw, cb)  per-row scratch: the W-padded, H-pooled row
    """
    h = x_ref.shape[1]
    w = x_ref.shape[2]
    cb = x_ref.shape[3]
    oh_n = o_ref.shape[1]
    ow_n = o_ref.shape[2]
    dtype = o_ref.dtype

    # The pad columns of the row scratch never change: write them once per grid step.
    if pw > 0:
        pad_cols = jnp.full((pw, cb), pad_val, dtype)
        row_ref[pl.ds(0, pw), :] = pad_cols
        row_ref[pl.ds(w + pw, pw), :] = pad_cols

    def wslice(dj):
        if sw == 1:
            return row_ref[pl.ds(dj, ow_n), :]
        return row_ref[pl.ds(dj, ow_n, stride=sw), :]

    # Statically unrolled per-output-row loop: OH is static, so the fused -inf
    # H-padding becomes trace-time row validity (no masking ops at runtime).
    for oh in range(oh_n):
        r0 = oh * sh - ph
        valid_rows = [r0 + di for di in range(kh) if 0 <= r0 + di < h]

        if valid_rows:
            hrow = x_ref[0, valid_rows[0], :, :]                  # (W, cb)
            for r in valid_rows[1:]:
                hrow = jnp.maximum(hrow, x_ref[0, r, :, :])
        else:
            # Window lies entirely in the padding (only if padding >= kernel size):
            # the module would emit -inf here too.
            hrow = jnp.full((w, cb), pad_val, dtype)

        # Fused stage 2: W-pad the pooled row in the scratch, reduce the kw window
        # columns with sublane-strided loads, store one dense (OW, cb) output row.
        row_ref[pl.ds(pw, w), :] = hrow
        acc = wslice(0)
        for dj in range(1, kw):
            acc = jnp.maximum(acc, wslice(dj))
        o_ref[0, oh, :, :] = acc.astype(dtype)


def maxpool2d(x: jax.Array,
              kernel_size: IntOrPair,
              stride: Optional[IntOrPair] = None,
              padding: IntOrPair = 1) -> jax.Array:
    """Pallas equivalent of MaxPool2d(kernel_size, stride, padding).forward(x), NCHW in/out."""
    kh, kw = _force_pair(kernel_size)
    sh, sw = _force_pair(stride) if stride else (kh, kw)
    ph, pw = _force_pair(padding)

    b, c, h, w = x.shape
    hp, wp = h + 2 * ph, w + 2 * pw
    oh = (hp - kh) // sh + 1
    ow = (wp - kw) // sw + 1
    if oh <= 0 or ow <= 0:
        raise ValueError("maxpool2d: non-positive output size")

    pad_val = _pad_value(x.dtype)
    itemsize = x.dtype.itemsize
    vmem_limit = _vmem_limit_bytes()

    # NCHW -> NHWC so channels ride the lane axis inside the kernel (no jnp.pad pass).
    # TODO(synk): an NCHW-native path (W on lanes) would drop both transposes, but the
    # stride-sw column subsample then needs a lane-strided (minormost-dim) load, which
    # Mosaic does not support; revisit if minormost strided loads land.
    x_nhwc = jnp.transpose(x, (0, 2, 3, 1))

    # Channel block: the (8,128) rule requires the last block dim to be full C or a
    # multiple of 128.  Pick the largest 128-multiple divisor of C whose input block
    # stays within ~1/4 of the VMEM limit (headroom for double-buffering + output).
    block_budget = vmem_limit // 4
    if c % 128 == 0:
        cands = [d for d in range(128, c + 1, 128) if c % d == 0]
        fitting = [d for d in cands if h * w * d * itemsize <= block_budget]
        cb = max(fitting) if fitting else min(cands)
    else:
        # TODO(synk): C < 128 gives lane-sparse blocks, and very large spatial maps
        # with small C would need an OH-tile grid axis (element-offset H blocks).
        cb = c
    grid = (b, c // cb)

    kernel = functools.partial(_maxpool_kernel, kh=kh, kw=kw, sh=sh, sw=sw,
                               ph=ph, pw=pw, pad_val=pad_val)

    cost = pl.CostEstimate(
        flops=int(b * c * oh * ow * max(kh * kw - 1, 1)),
        transcendentals=0,
        bytes_accessed=int(b * c * (h * w + oh * ow) * itemsize),
    )

    out_nhwc = pl.pallas_call(
        kernel,
        out_shape=jax.ShapeDtypeStruct((b, oh, ow, c), x.dtype),
        grid=grid,
        in_specs=[pl.BlockSpec((1, h, w, cb), lambda bi, ci: (bi, 0, 0, ci))],
        out_specs=pl.BlockSpec((1, oh, ow, cb), lambda bi, ci: (bi, 0, 0, ci)),
        scratch_shapes=[pltpu.VMEM((w + 2 * pw, cb), x.dtype)],
        compiler_params=pltpu.CompilerParams(
            dimension_semantics=("parallel", "parallel"),
            vmem_limit_bytes=vmem_limit,
        ),
        cost_estimate=cost,
    )(x_nhwc)

    # Back to the module's NCHW output layout.
    return jnp.transpose(out_nhwc, (0, 3, 1, 2))


def _ref_maxpool(x, kernel_size, stride=None, padding=1):
    """Pure-JAX reference with identical semantics (pad with -inf, VALID windowed max)."""
    kh, kw = _force_pair(kernel_size)
    sh, sw = _force_pair(stride) if stride else (kh, kw)
    ph, pw = _force_pair(padding)
    xp = jnp.pad(x, ((0, 0), (0, 0), (ph, ph), (pw, pw)),
                 mode="constant", constant_values=-jnp.inf)
    init = jnp.array(-jnp.inf, dtype=x.dtype)
    return lax.reduce_window(xp, init, lax.max,
                             (1, 1, kh, kw), (1, 1, sh, sw), "VALID")


if __name__ == "__main__":
    key = jax.random.PRNGKey(0)
    x = jax.random.normal(key, (2, 4, 16, 16), dtype=jnp.float32)

    # Case 1: module defaults — kernel_size=2 (stride defaults to kernel), padding=1.
    out1 = jax.block_until_ready(maxpool2d(x, kernel_size=2))
    ref1 = _ref_maxpool(x, kernel_size=2)
    assert out1.shape == ref1.shape == (2, 4, 9, 9)
    assert out1.dtype == x.dtype
    assert bool(jnp.array_equal(out1, ref1))

    # Case 2: overlapping windows — kernel_size=3, stride=2, padding=1 (ResNet-style).
    out2 = jax.block_until_ready(maxpool2d(x, kernel_size=3, stride=2, padding=1))
    ref2 = _ref_maxpool(x, kernel_size=3, stride=2, padding=1)
    assert out2.shape == ref2.shape == (2, 4, 8, 8)
    assert bool(jnp.array_equal(out2, ref2))

    print("KERNEL_OK")
</pallas_src>

<mosaic_0001>
module attributes {stable_mosaic.version = 11 : i64} {
  func.func @_maxpool_kernel(%arg0: i32, %arg1: i32, %arg2: memref<1x16x16x4xf32, #tpu.memory_space<vmem>>, %arg3: memref<1x9x9x4xf32, #tpu.memory_space<vmem>>, %arg4: memref<18x4xf32, #tpu.memory_space<vmem>>) attributes {dimension_semantics = [#tpu.dimension_semantics<parallel>, #tpu.dimension_semantics<parallel>], iteration_bounds = array<i64: 2, 1>, scalar_prefetch = 0 : i64, scratch_operands = 1 : i64, tpu.core_type = #tpu.core_type<tc>, window_params = [{transform_indices = @transform_0, window_bounds = array<i64: 1, 16, 16, 4>}, {transform_indices = @transform_1, window_bounds = array<i64: 1, 9, 9, 4>}]} {
    %cst = arith.constant 0xFF800000 : f32
    %0 = vector.broadcast %cst : f32 to vector<1x4xf32>
    %c0 = arith.constant 0 : index
    %c0_0 = arith.constant 0 : index
    %1 = vector.load %arg4[%c0, %c0_0] : memref<18x4xf32, #tpu.memory_space<vmem>>, vector<1x4xf32>
    tpu.vector_store %arg4[%c0, %c0_0], %0 {strides = array<i32>} : memref<18x4xf32, #tpu.memory_space<vmem>>, vector<1x4xf32>,
    %c17 = arith.constant 17 : index
    %c0_1 = arith.constant 0 : index
    %2 = vector.load %arg4[%c17, %c0_1] : memref<18x4xf32, #tpu.memory_space<vmem>>, vector<1x4xf32>
    tpu.vector_store %arg4[%c17, %c0_1], %0 {strides = array<i32>} : memref<18x4xf32, #tpu.memory_space<vmem>>, vector<1x4xf32>,
    %c0_2 = arith.constant 0 : index
    %c0_3 = arith.constant 0 : index
    %c0_4 = arith.constant 0 : index
    %c0_5 = arith.constant 0 : index
    %3 = vector.load %arg2[%c0_2, %c0_3, %c0_4, %c0_5] : memref<1x16x16x4xf32, #tpu.memory_space<vmem>>, vector<1x1x16x4xf32>
    %4 = vector.shape_cast %3 : vector<1x1x16x4xf32> to vector<16x4xf32>
    %c1 = arith.constant 1 : index
    %c0_6 = arith.constant 0 : index
    %5 = vector.load %arg4[%c1, %c0_6] : memref<18x4xf32, #tpu.memory_space<vmem>>, vector<16x4xf32>
    tpu.vector_store %arg4[%c1, %c0_6], %4 {strides = array<i32>} : memref<18x4xf32, #tpu.memory_space<vmem>>, vector<16x4xf32>,
    %c0_7 = arith.constant 0 : index
    %c0_8 = arith.constant 0 : index
    %6 = tpu.strided_load %arg4[%c0_7, %c0_8] {strides = array<i32: 2, 1>} : memref<18x4xf32, #tpu.memory_space<vmem>>, vector<9x4xf32>
    %c1_9 = arith.constant 1 : index
    %c0_10 = arith.constant 0 : index
    %7 = tpu.strided_load %arg4[%c1_9, %c0_10] {strides = array<i32: 2, 1>} : memref<18x4xf32, #tpu.memory_space<vmem>>, vector<9x4xf32>
    %8 = arith.maximumf %6, %7 : vector<9x4xf32>
    %c0_11 = arith.constant 0 : index
    %c0_12 = arith.constant 0 : index
    %c0_13 = arith.constant 0 : index
    %c0_14 = arith.constant 0 : index
    %9 = vector.load %arg3[%c0_11, %c0_12, %c0_13, %c0_14] : memref<1x9x9x4xf32, #tpu.memory_space<vmem>>, vector<1x1x9x4xf32>
    %10 = vector.shape_cast %9 : vector<1x1x9x4xf32> to vector<9x4xf32>
    %11 = vector.shape_cast %8 : vector<9x4xf32> to vector<1x1x9x4xf32>
    tpu.vector_store %arg3[%c0_11, %c0_12, %c0_13, %c0_14], %11 {strides = array<i32>} : memref<1x9x9x4xf32, #tpu.memory_space<vmem>>, vector<1x1x9x4xf32>,
    %c0_15 = arith.constant 0 : index
    %c1_16 = arith.constant 1 : index
    %c0_17 = arith.constant 0 : index
    %c0_18 = arith.constant 0 : index
    %12 = vector.load %arg2[%c0_15, %c1_16, %c0_17, %c0_18] : memref<1x16x16x4xf32, #tpu.memory_space<vmem>>, vector<1x1x16x4xf32>
    %13 = vector.shape_cast %12 : vector<1x1x16x4xf32> to vector<16x4xf32>
    %c0_19 = arith.constant 0 : index
    %c2 = arith.constant 2 : index
    %c0_20 = arith.constant 0 : index
    %c0_21 = arith.constant 0 : index
    %14 = vector.load %arg2[%c0_19, %c2, %c0_20, %c0_21] : memref<1x16x16x4xf32, #tpu.memory_space<vmem>>, vector<1x1x16x4xf32>
    %15 = vector.shape_cast %14 : vector<1x1x16x4xf32> to vector<16x4xf32>
    %16 = arith.maximumf %13, %15 : vector<16x4xf32>
    %c1_22 = arith.constant 1 : index
    %c0_23 = arith.constant 0 : index
    %17 = vector.load %arg4[%c1_22, %c0_23] : memref<18x4xf32, #tpu.memory_space<vmem>>, vector<16x4xf32>
    tpu.vector_store %arg4[%c1_22, %c0_23], %16 {strides = array<i32>} : memref<18x4xf32, #tpu.memory_space<vmem>>, vector<16x4xf32>,
    %c0_24 = arith.constant 0 : index
    %c0_25 = arith.constant 0 : index
    %18 = tpu.strided_load %arg4[%c0_24, %c0_25] {strides = array<i32: 2, 1>} : memref<18x4xf32, #tpu.memory_space<vmem>>, vector<9x4xf32>
    %c1_26 = arith.constant 1 : index
    %c0_27 = arith.constant 0 : index
    %19 = tpu.strided_load %arg4[%c1_26, %c0_27] {strides = array<i32: 2, 1>} : memref<18x4xf32, #tpu.memory_space<vmem>>, vector<9x4xf32>
    %20 = arith.maximumf %18, %19 : vector<9x4xf32>
    %c0_28 = arith.constant 0 : index
    %c1_29 = arith.constant 1 : index
    %c0_30 = arith.constant 0 : index
    %c0_31 = arith.constant 0 : index
    %21 = vector.load %arg3[%c0_28, %c1_29, %c0_30, %c0_31] : memref<1x9x9x4xf32, #tpu.memory_space<vmem>>, vector<1x1x9x4xf32>
    %22 = vector.shape_cast %21 : vector<1x1x9x4xf32> to vector<9x4xf32>
    %23 = vector.shape_cast %20 : vector<9x4xf32> to vector<1x1x9x4xf32>
    tpu.vector_store %arg3[%c0_28, %c1_29, %c0_30, %c0_31], %23 {strides = array<i32>} : memref<1x9x9x4xf32, #tpu.memory_space<vmem>>, vector<1x1x9x4xf32>,
    %c0_32 = arith.constant 0 : index
    %c3 = arith.constant 3 : index
    %c0_33 = arith.constant 0 : index
    %c0_34 = arith.constant 0 : index
    %24 = vector.load %arg2[%c0_32, %c3, %c0_33, %c0_34] : memref<1x16x16x4xf32, #tpu.memory_space<vmem>>, vector<1x1x16x4xf32>
    %25 = vector.shape_cast %24 : vector<1x1x16x4xf32> to vector<16x4xf32>
    %c0_35 = arith.constant 0 : index
    %c4 = arith.constant 4 : index
    %c0_36 = arith.constant 0 : index
    %c0_37 = arith.constant 0 : index
    %26 = vector.load %arg2[%c0_35, %c4, %c0_36, %c0_37] : memref<1x16x16x4xf32, #tpu.memory_space<vmem>>, vector<1x1x16x4xf32>
    %27 = vector.shape_cast %26 : vector<1x1x16x4xf32> to vector<16x4xf32>
    %28 = arith.maximumf %25, %27 : vector<16x4xf32>
    %c1_38 = arith.constant 1 : index
    %c0_39 = arith.constant 0 : index
    %29 = vector.load %arg4[%c1_38, %c0_39] : memref<18x4xf32, #tpu.memory_space<vmem>>, vector<16x4xf32>
    tpu.vector_store %arg4[%c1_38, %c0_39], %28 {strides = array<i32>} : memref<18x4xf32, #tpu.memory_space<vmem>>, vector<16x4xf32>,
    %c0_40 = arith.constant 0 : index
    %c0_41 = arith.constant 0 : index
    %30 = tpu.strided_load %arg4[%c0_40, %c0_41] {strides = array<i32: 2, 1>} : memref<18x4xf32, #tpu.memory_space<vmem>>, vector<9x4xf32>
    %c1_42 = arith.constant 1 : index
    %c0_43 = arith.constant 0 : index
    %31 = tpu.strided_load %arg4[%c1_42, %c0_43] {strides = array<i32: 2, 1>} : memref<18x4xf32, #tpu.memory_space<vmem>>, vector<9x4xf32>
    %32 = arith.maximumf %30, %31 : vector<9x4xf32>
    %c0_44 = arith.constant 0 : index
    %c2_45 = arith.constant 2 : index
    %c0_46 = arith.constant 0 : index
    %c0_47 = arith.constant 0 : index
    %33 = vector.load %arg3[%c0_44, %c2_45, %c0_46, %c0_47] : memref<1x9x9x4xf32, #tpu.memory_space<vmem>>, vector<1x1x9x4xf32>
    %34 = vector.shape_cast %33 : vector<1x1x9x4xf32> to vector<9x4xf32>
    %35 = vector.shape_cast %32 : vector<9x4xf32> to vector<1x1x9x4xf32>
    tpu.vector_store %arg3[%c0_44, %c2_45, %c0_46, %c0_47], %35 {strides = array<i32>} : memref<1x9x9x4xf32, #tpu.memory_space<vmem>>, vector<1x1x9x4xf32>,
    %c0_48 = arith.constant 0 : index
    %c5 = arith.constant 5 : index
    %c0_49 = arith.constant 0 : index
    %c0_50 = arith.constant 0 : index
    %36 = vector.load %arg2[%c0_48, %c5, %c0_49, %c0_50] : memref<1x16x16x4xf32, #tpu.memory_space<vmem>>, vector<1x1x16x4xf32>
    %37 = vector.shape_cast %36 : vector<1x1x16x4xf32> to vector<16x4xf32>
    %c0_51 = arith.constant 0 : index
    %c6 = arith.constant 6 : index
    %c0_52 = arith.constant 0 : index
    %c0_53 = arith.constant 0 : index
    %38 = vector.load %arg2[%c0_51, %c6, %c0_52, %c0_53] : memref<1x16x16x4xf32, #tpu.memory_space<vmem>>, vector<1x1x16x4xf32>
    %39 = vector.shape_cast %38 : vector<1x1x16x4xf32> to vector<16x4xf32>
    %40 = arith.maximumf %37, %39 : vector<16x4xf32>
    %c1_54 = arith.constant 1 : index
    %c0_55 = arith.constant 0 : index
    %41 = vector.load %arg4[%c1_54, %c0_55] : memref<18x4xf32, #tpu.memory_space<vmem>>, vector<16x4xf32>
    tpu.vector_store %arg4[%c1_54, %c0_55], %40 {strides = array<i32>} : memref<18x4xf32, #tpu.memory_space<vmem>>, vector<16x4xf32>,
    %c0_56 = arith.constant 0 : index
    %c0_57 = arith.constant 0 : index
    %42 = tpu.strided_load %arg4[%c0_56, %c0_57] {strides = array<i32: 2, 1>} : memref<18x4xf32, #tpu.memory_space<vmem>>, vector<9x4xf32>
    %c1_58 = arith.constant 1 : index
    %c0_59 = arith.constant 0 : index
    %43 = tpu.strided_load %arg4[%c1_58, %c0_59] {strides = array<i32: 2, 1>} : memref<18x4xf32, #tpu.memory_space<vmem>>, vector<9x4xf32>
    %44 = arith.maximumf %42, %43 : vector<9x4xf32>
    %c0_60 = arith.constant 0 : index
    %c3_61 = arith.constant 3 : index
    %c0_62 = arith.constant 0 : index
    %c0_63 = arith.constant 0 : index
    %45 = vector.load %arg3[%c0_60, %c3_61, %c0_62, %c0_63] : memref<1x9x9x4xf32, #tpu.memory_space<vmem>>, vector<1x1x9x4xf32>
    %46 = vector.shape_cast %45 : vector<1x1x9x4xf32> to vector<9x4xf32>
    %47 = vector.shape_cast %44 : vector<9x4xf32> to vector<1x1x9x4xf32>
    tpu.vector_store %arg3[%c0_60, %c3_61, %c0_62, %c0_63], %47 {strides = array<i32>} : memref<1x9x9x4xf32, #tpu.memory_space<vmem>>, vector<1x1x9x4xf32>,
    %c0_64 = arith.constant 0 : index
    %c7 = arith.constant 7 : index
    %c0_65 = arith.constant 0 : index
    %c0_66 = arith.constant 0 : index
    %48 = vector.load %arg2[%c0_64, %c7, %c0_65, %c0_66] : memref<1x16x16x4xf32, #tpu.memory_space<vmem>>, vector<1x1x16x4xf32>
    %49 = vector.shape_cast %48 : vector<1x1x16x4xf32> to vector<16x4xf32>
    %c0_67 = arith.constant 0 : index
    %c8 = arith.constant 8 : index
    %c0_68 = arith.constant 0 : index
    %c0_69 = arith.constant 0 : index
    %50 = vector.load %arg2[%c0_67, %c8, %c0_68, %c0_69] : memref<1x16x16x4xf32, #tpu.memory_space<vmem>>, vector<1x1x16x4xf32>
    %51 = vector.shape_cast %50 : vector<1x1x16x4xf32> to vector<16x4xf32>
    %52 = arith.maximumf %49, %51 : vector<16x4xf32>
    %c1_70 = arith.constant 1 : index
    %c0_71 = arith.constant 0 : index
    %53 = vector.load %arg4[%c1_70, %c0_71] : memref<18x4xf32, #tpu.memory_space<vmem>>, vector<16x4xf32>
    tpu.vector_store %arg4[%c1_70, %c0_71], %52 {strides = array<i32>} : memref<18x4xf32, #tpu.memory_space<vmem>>, vector<16x4xf32>,
    %c0_72 = arith.constant 0 : index
    %c0_73 = arith.constant 0 : index
    %54 = tpu.strided_load %arg4[%c0_72, %c0_73] {strides = array<i32: 2, 1>} : memref<18x4xf32, #tpu.memory_space<vmem>>, vector<9x4xf32>
    %c1_74 = arith.constant 1 : index
    %c0_75 = arith.constant 0 : index
    %55 = tpu.strided_load %arg4[%c1_74, %c0_75] {strides = array<i32: 2, 1>} : memref<18x4xf32, #tpu.memory_space<vmem>>, vector<9x4xf32>
    %56 = arith.maximumf %54, %55 : vector<9x4xf32>
    %c0_76 = arith.constant 0 : index
    %c4_77 = arith.constant 4 : index
    %c0_78 = arith.constant 0 : index
    %c0_79 = arith.constant 0 : index
    %57 = vector.load %arg3[%c0_76, %c4_77, %c0_78, %c0_79] : memref<1x9x9x4xf32, #tpu.memory_space<vmem>>, vector<1x1x9x4xf32>
    %58 = vector.shape_cast %57 : vector<1x1x9x4xf32> to vector<9x4xf32>
    %59 = vector.shape_cast %56 : vector<9x4xf32> to vector<1x1x9x4xf32>
    tpu.vector_store %arg3[%c0_76, %c4_77, %c0_78, %c0_79], %59 {strides = array<i32>} : memref<1x9x9x4xf32, #tpu.memory_space<vmem>>, vector<1x1x9x4xf32>,
    %c0_80 = arith.constant 0 : index
    %c9 = arith.constant 9 : index
    %c0_81 = arith.constant 0 : index
    %c0_82 = arith.constant 0 : index
    %60 = vector.load %arg2[%c0_80, %c9, %c0_81, %c0_82] : memref<1x16x16x4xf32, #tpu.memory_space<vmem>>, vector<1x1x16x4xf32>
    %61 = vector.shape_cast %60 : vector<1x1x16x4xf32> to vector<16x4xf32>
    %c0_83 = arith.constant 0 : index
    %c10 = arith.constant 10 : index
    %c0_84 = arith.constant 0 : index
    %c0_85 = arith.constant 0 : index
    %62 = vector.load %arg2[%c0_83, %c10, %c0_84, %c0_85] : memref<1x16x16x4xf32, #tpu.memory_space<vmem>>, vector<1x1x16x4xf32>
    %63 = vector.shape_cast %62 : vector<1x1x16x4xf32> to vector<16x4xf32>
    %64 = arith.maximumf %61, %63 : vector<16x4xf32>
    %c1_86 = arith.constant 1 : index
    %c0_87 = arith.constant 0 : index
    %65 = vector.load %arg4[%c1_86, %c0_87] : memref<18x4xf32, #tpu.memory_space<vmem>>, vector<16x4xf32>
    tpu.vector_store %arg4[%c1_86, %c0_87], %64 {strides = array<i32>} : memref<18x4xf32, #tpu.memory_space<vmem>>, vector<16x4xf32>,
    %c0_88 = arith.constant 0 : index
    %c0_89 = arith.constant 0 : index
    %66 = tpu.strided_load %arg4[%c0_88, %c0_89] {strides = array<i32: 2, 1>} : memref<18x4xf32, #tpu.memory_space<vmem>>, vector<9x4xf32>
    %c1_90 = arith.constant 1 : index
    %c0_91 = arith.constant 0 : index
    %67 = tpu.strided_load %arg4[%c1_90, %c0_91] {strides = array<i32: 2, 1>} : memref<18x4xf32, #tpu.memory_space<vmem>>, vector<9x4xf32>
    %68 = arith.maximumf %66, %67 : vector<9x4xf32>
    %c0_92 = arith.constant 0 : index
    %c5_93 = arith.constant 5 : index
    %c0_94 = arith.constant 0 : index
    %c0_95 = arith.constant 0 : index
    %69 = vector.load %arg3[%c0_92, %c5_93, %c0_94, %c0_95] : memref<1x9x9x4xf32, #tpu.memory_space<vmem>>, vector<1x1x9x4xf32>
    %70 = vector.shape_cast %69 : vector<1x1x9x4xf32> to vector<9x4xf32>
    %71 = vector.shape_cast %68 : vector<9x4xf32> to vector<1x1x9x4xf32>
    tpu.vector_store %arg3[%c0_92, %c5_93, %c0_94, %c0_95], %71 {strides = array<i32>} : memref<1x9x9x4xf32, #tpu.memory_space<vmem>>, vector<1x1x9x4xf32>,
    %c0_96 = arith.constant 0 : index
    %c11 = arith.constant 11 : index
    %c0_97 = arith.constant 0 : index
    %c0_98 = arith.constant 0 : index
    %72 = vector.load %arg2[%c0_96, %c11, %c0_97, %c0_98] : memref<1x16x16x4xf32, #tpu.memory_space<vmem>>, vector<1x1x16x4xf32>
    %73 = vector.shape_cast %72 : vector<1x1x16x4xf32> to vector<16x4xf32>
    %c0_99 = arith.constant 0 : index
    %c12 = arith.constant 12 : index
    %c0_100 = arith.constant 0 : index
    %c0_101 = arith.constant 0 : index
    %74 = vector.load %arg2[%c0_99, %c12, %c0_100, %c0_101] : memref<1x16x16x4xf32, #tpu.memory_space<vmem>>, vector<1x1x16x4xf32>
    %75 = vector.shape_cast %74 : vector<1x1x16x4xf32> to vector<16x4xf32>
    %76 = arith.maximumf %73, %75 : vector<16x4xf32>
    %c1_102 = arith.constant 1 : index
    %c0_103 = arith.constant 0 : index
    %77 = vector.load %arg4[%c1_102, %c0_103] : memref<18x4xf32, #tpu.memory_space<vmem>>, vector<16x4xf32>
    tpu.vector_store %arg4[%c1_102, %c0_103], %76 {strides = array<i32>} : memref<18x4xf32, #tpu.memory_space<vmem>>, vector<16x4xf32>,
    %c0_104 = arith.constant 0 : index
    %c0_105 = arith.constant 0 : index
    %78 = tpu.strided_load %arg4[%c0_104, %c0_105] {strides = array<i32: 2, 1>} : memref<18x4xf32, #tpu.memory_space<vmem>>, vector<9x4xf32>
    %c1_106 = arith.constant 1 : index
    %c0_107 = arith.constant 0 : index
    %79 = tpu.strided_load %arg4[%c1_106, %c0_107] {strides = array<i32: 2, 1>} : memref<18x4xf32, #tpu.memory_space<vmem>>, vector<9x4xf32>
    %80 = arith.maximumf %78, %79 : vector<9x4xf32>
    %c0_108 = arith.constant 0 : index
    %c6_109 = arith.constant 6 : index
    %c0_110 = arith.constant 0 : index
    %c0_111 = arith.constant 0 : index
    %81 = vector.load %arg3[%c0_108, %c6_109, %c0_110, %c0_111] : memref<1x9x9x4xf32, #tpu.memory_space<vmem>>, vector<1x1x9x4xf32>
    %82 = vector.shape_cast %81 : vector<1x1x9x4xf32> to vector<9x4xf32>
    %83 = vector.shape_cast %80 : vector<9x4xf32> to vector<1x1x9x4xf32>
    tpu.vector_store %arg3[%c0_108, %c6_109, %c0_110, %c0_111], %83 {strides = array<i32>} : memref<1x9x9x4xf32, #tpu.memory_space<vmem>>, vector<1x1x9x4xf32>,
    %c0_112 = arith.constant 0 : index
    %c13 = arith.constant 13 : index
    %c0_113 = arith.constant 0 : index
    %c0_114 = arith.constant 0 : index
    %84 = vector.load %arg2[%c0_112, %c13, %c0_113, %c0_114] : memref<1x16x16x4xf32, #tpu.memory_space<vmem>>, vector<1x1x16x4xf32>
    %85 = vector.shape_cast %84 : vector<1x1x16x4xf32> to vector<16x4xf32>
    %c0_115 = arith.constant 0 : index
    %c14 = arith.constant 14 : index
    %c0_116 = arith.constant 0 : index
    %c0_117 = arith.constant 0 : index
    %86 = vector.load %arg2[%c0_115, %c14, %c0_116, %c0_117] : memref<1x16x16x4xf32, #tpu.memory_space<vmem>>, vector<1x1x16x4xf32>
    %87 = vector.shape_cast %86 : vector<1x1x16x4xf32> to vector<16x4xf32>
    %88 = arith.maximumf %85, %87 : vector<16x4xf32>
    %c1_118 = arith.constant 1 : index
    %c0_119 = arith.constant 0 : index
    %89 = vector.load %arg4[%c1_118, %c0_119] : memref<18x4xf32, #tpu.memory_space<vmem>>, vector<16x4xf32>
    tpu.vector_store %arg4[%c1_118, %c0_119], %88 {strides = array<i32>} : memref<18x4xf32, #tpu.memory_space<vmem>>, vector<16x4xf32>,
    %c0_120 = arith.constant 0 : index
    %c0_121 = arith.constant 0 : index
    %90 = tpu.strided_load %arg4[%c0_120, %c0_121] {strides = array<i32: 2, 1>} : memref<18x4xf32, #tpu.memory_space<vmem>>, vector<9x4xf32>
    %c1_122 = arith.constant 1 : index
    %c0_123 = arith.constant 0 : index
    %91 = tpu.strided_load %arg4[%c1_122, %c0_123] {strides = array<i32: 2, 1>} : memref<18x4xf32, #tpu.memory_space<vmem>>, vector<9x4xf32>
    %92 = arith.maximumf %90, %91 : vector<9x4xf32>
    %c0_124 = arith.constant 0 : index
    %c7_125 = arith.constant 7 : index
    %c0_126 = arith.constant 0 : index
    %c0_127 = arith.constant 0 : index
    %93 = vector.load %arg3[%c0_124, %c7_125, %c0_126, %c0_127] : memref<1x9x9x4xf32, #tpu.memory_space<vmem>>, vector<1x1x9x4xf32>
    %94 = vector.shape_cast %93 : vector<1x1x9x4xf32> to vector<9x4xf32>
    %95 = vector.shape_cast %92 : vector<9x4xf32> to vector<1x1x9x4xf32>
    tpu.vector_store %arg3[%c0_124, %c7_125, %c0_126, %c0_127], %95 {strides = array<i32>} : memref<1x9x9x4xf32, #tpu.memory_space<vmem>>, vector<1x1x9x4xf32>,
    %c0_128 = arith.constant 0 : index
    %c15 = arith.constant 15 : index
    %c0_129 = arith.constant 0 : index
    %c0_130 = arith.constant 0 : index
    %96 = vector.load %arg2[%c0_128, %c15, %c0_129, %c0_130] : memref<1x16x16x4xf32, #tpu.memory_space<vmem>>, vector<1x1x16x4xf32>
    %97 = vector.shape_cast %96 : vector<1x1x16x4xf32> to vector<16x4xf32>
    %c1_131 = arith.constant 1 : index
    %c0_132 = arith.constant 0 : index
    %98 = vector.load %arg4[%c1_131, %c0_132] : memref<18x4xf32, #tpu.memory_space<vmem>>, vector<16x4xf32>
    tpu.vector_store %arg4[%c1_131, %c0_132], %97 {strides = array<i32>} : memref<18x4xf32, #tpu.memory_space<vmem>>, vector<16x4xf32>,
    %c0_133 = arith.constant 0 : index
    %c0_134 = arith.constant 0 : index
    %99 = tpu.strided_load %arg4[%c0_133, %c0_134] {strides = array<i32: 2, 1>} : memref<18x4xf32, #tpu.memory_space<vmem>>, vector<9x4xf32>
    %c1_135 = arith.constant 1 : index
    %c0_136 = arith.constant 0 : index
    %100 = tpu.strided_load %arg4[%c1_135, %c0_136] {strides = array<i32: 2, 1>} : memref<18x4xf32, #tpu.memory_space<vmem>>, vector<9x4xf32>
    %101 = arith.maximumf %99, %100 : vector<9x4xf32>
    %c0_137 = arith.constant 0 : index
    %c8_138 = arith.constant 8 : index
    %c0_139 = arith.constant 0 : index
    %c0_140 = arith.constant 0 : index
    %102 = vector.load %arg3[%c0_137, %c8_138, %c0_139, %c0_140] : memref<1x9x9x4xf32, #tpu.memory_space<vmem>>, vector<1x1x9x4xf32>
    %103 = vector.shape_cast %102 : vector<1x1x9x4xf32> to vector<9x4xf32>
    %104 = vector.shape_cast %101 : vector<9x4xf32> to vector<1x1x9x4xf32>
    tpu.vector_store %arg3[%c0_137, %c8_138, %c0_139, %c0_140], %104 {strides = array<i32>} : memref<1x9x9x4xf32, #tpu.memory_space<vmem>>, vector<1x1x9x4xf32>,
    return
  }
  func.func @transform_0(%arg0: i32, %arg1: i32) -> (i32, i32, i32, i32) {
    %c0_i32 = arith.constant 0 : i32
    %c0_i32_0 = arith.constant 0 : i32
    %c0_i32_1 = arith.constant 0 : i32
    return %arg0, %c0_i32, %c0_i32_0, %arg1 : i32, i32, i32, i32
  }
  func.func @transform_1(%arg0: i32, %arg1: i32) -> (i32, i32, i32, i32) {
    %c0_i32 = arith.constant 0 : i32
    %c0_i32_0 = arith.constant 0 : i32
    %c0_i32_1 = arith.constant 0 : i32
    return %arg0, %c0_i32, %c0_i32_0, %arg1 : i32, i32, i32, i32
  }
}

</mosaic_0001>

<bundles_post_ra>
// kernel: tpu_custom_call.1
= control target key start
LH: loop header
LB: loop body
LE: loop exit
PB: predicated region body
PF: predicated region fallthrough
CT: control target
= control target key end

     0   :  { %s515_s6 = smov 0   ;;  %s517_s7 = smov 0   ;;  %s640_s0 = inlined_call_operand.vmem [shape: f32[2,16,16,4], index: 0, kind: input, shape index: {}]   ;;  %s641_s1 = inlined_call_operand.vmem [shape: f32[2,9,9,4], index: 1, kind: output, shape index: {}]  }
   0x1   :  { %s519_s8 = smov 0  }
   0x2 LB: > { %s23_s9 = sadd.s32 1, %s498_s7  ;;  %p401_p0 = scmp.ge.s32.totalorder %s502_s8, 1  ;;  %s502_s8 = sphi %s519_s8, %s11_s8   ;;  %s498_s7 = sphi %s517_s7, %s643_s7   ;;  %s494_s6 = sphi %s515_s6, %s642_s6  }
   0x3   : > { %p25_p1 = scmp.ge.s32.totalorder %s23_s9, 2  ;;  %p106_p2 = scmp.lt.s32.totalorder %s502_s8, 3 }
   0x5   : > { %s645_s9 = smov (%p25_p1, %s23_s9), 0  ;;  %p107_p3 = pnand %p401_p0, %p106_p2 }
   0x6   : > { %p132_p4 = scmp.lt.s32.totalorder (!%p107_p3), %s494_s6, 1 }
   0x7   : > { %110 = sbr.rel (%p107_p3) target bundleno = 100 (0x64), region = 24 }
   0xc   : > { %vm148_vm0 = vcmask 24576   ;;  %v504_v0 = vmov -inf   ;;  %s647_s6 = smov (!%p132_p4, %s494_s6), 1  ;;  %vm153_vm1 = vcmask 31744  }
   0xd   : > { %149 = vst.msk [vmem:[#allocation2] sm:$0x1] %vm148_vm0, %v504_v0  ;;  %150 = vst.msk [vmem:[#allocation2 + $0x11] sm:$0x1] %vm148_vm0, %v504_v0  ;;  %s453_s10 = sshll.u32 %s647_s6, 8  ;;  %s454_s14 = smul.u32 144, %s647_s6 }
   0xe   : > { %s538_s13 = scalar_lea.vmem %s640_s0, %s453_s10 }
   0xf   : > { %v151_v1 = vld [vmem:[%s538_s13] sm:$0xff]  ;;  %v152_v2 = vld [vmem:[%s538_s13 + $0x8] sm:$0xff]  ;;  %v405_v3 = vld [vmem:[%s538_s13 + $0x10] sm:$0xff]  ;;  %s551_s17 = scalar_lea.vmem %s641_s1, %s454_s14 }
  0x10   : > { %154 = vst.msk [vmem:[#allocation2 + $0x1] sm:$0xff] %vm153_vm1, %v151_v1  ;;  %155 = vst.msk [vmem:[#allocation2 + $0x9] sm:$0xff] %vm153_vm1, %v152_v2  ;;  %v407_v4 = vld [vmem:[%s538_s13 + $0x20] sm:$0xff]  ;;  %v406_v5 = vld [vmem:[%s538_s13 + $0x18] sm:$0xff] }
  0x11   : > { %v408_v6 = vld [vmem:[%s538_s13 + $0x28] sm:$0xff]  ;;  %v173_v7 = vmax.f32 %v405_v3, %v407_v4  ;;  %v411_v15 = vld [vmem:[%s538_s13 + $0x30] sm:$0xff]  ;;  %v413_v16 = vld [vmem:[%s538_s13 + $0x40] sm:$0xff] }
  0x12   : > { %v174_v8 = vmax.f32 %v406_v5, %v408_v6  ;;  %v412_v17 = vld [vmem:[%s538_s13 + $0x38] sm:$0xff]  ;;  %v414_v18 = vld [vmem:[%s538_s13 + $0x48] sm:$0xff]  ;;  %v192_v19 = vmax.f32 %v411_v15, %v413_v16  ;;  %v417_v27 = vld [vmem:[%s538_s13 + $0x50] sm:$0xff] }
  0x13   : > { %v193_v20 = vmax.f32 %v412_v17, %v414_v18  ;;  %v419_v28 = vld [vmem:[%s538_s13 + $0x60] sm:$0xff]  ;;  %v418_v29 = vld [vmem:[%s538_s13 + $0x58] sm:$0xff]  ;;  %v420_v30 = vld [vmem:[%s538_s13 + $0x68] sm:$0xff] }
  0x14   : > { %v162_v9 = vld [vmem:[#allocation2 + $0x11] ss:$2 sm:$0x1]  ;;  %v211_v31 = vmax.f32 %v417_v27, %v419_v28  ;;  %v212_v32 = vmax.f32 %v418_v29, %v420_v30  ;;  %v425_v40 = vld [vmem:[%s538_s13 + $0x80] sm:$0xff]  ;;  %v424_v41 = vld [vmem:[%s538_s13 + $0x78] sm:$0xff] }
  0x15   : > { %v180_v21 = vld [vmem:[#allocation2 + $0x11] ss:$2 sm:$0x1]  ;;  %v426_v42 = vld [vmem:[%s538_s13 + $0x88] sm:$0xff]  ;;  %v431_v52 = vld [vmem:[%s538_s13 + $0xa0] sm:$0xff] }
  0x16   : > { %v199_v33 = vld [vmem:[#allocation2 + $0x11] ss:$2 sm:$0x1]  ;;  %v231_v44 = vmax.f32 %v424_v41, %v426_v42  ;;  %v430_v53 = vld [vmem:[%s538_s13 + $0x98] sm:$0xff]  ;;  %v432_v54 = vld [vmem:[%s538_s13 + $0xa8] sm:$0xff] }
  0x17   : > { %v156_v10 = vld [vmem:[#allocation2] ss:$2 sm:$0xff]  ;;  %v160_v11 = vld [vmem:[#allocation2 + $0x1] ss:$2 sm:$0xff]  ;;  %v423_v39 = vld [vmem:[%s538_s13 + $0x70] sm:$0xff]  ;;  %v250_v56 = vmax.f32 %v430_v53, %v432_v54 }
  0x18   : > { %175 = vst.msk [vmem:[#allocation2 + $0x1] sm:$0xff] %vm153_vm1, %v173_v7  ;;  %v158_v12 = vld [vmem:[#allocation2 + $0x10] ss:$2 sm:$0x1]  ;;  %v163_v13 = vmax.f32 %v156_v10, %v160_v11  ;;  %v230_v43 = vmax.f32 %v423_v39, %v425_v40  ;;  %v437_v0 = vld [vmem:[%s538_s13 + $0xc0] sm:$0xff]  ;;  %v436_v1 = vld [vmem:[%s538_s13 + $0xb8] sm:$0xff] }
  0x19   : > { %176 = vst.msk [vmem:[#allocation2 + $0x9] sm:$0xff] %vm153_vm1, %v174_v8  ;;  %v164_v14 = vmax.f32 %v158_v12, %v162_v9  ;;  %v218_v45 = vld [vmem:[#allocation2 + $0x11] ss:$2 sm:$0x1]  ;;  %v438_v2 = vld [vmem:[%s538_s13 + $0xc8] sm:$0xff]  ;;  %v443_v12 = vld [vmem:[%s538_s13 + $0xe0] sm:$0xff] }
  0x1a   : > { %165 = vst.msk [vmem:[%s551_s17] sm:$0xff] %vm153_vm1, %v163_v13  ;;  %v429_v51 = vld [vmem:[%s538_s13 + $0x90] sm:$0xff]  ;;  %v269_v4 = vmax.f32 %v436_v1, %v438_v2  ;;  %v442_v13 = vld [vmem:[%s538_s13 + $0xd8] sm:$0xff] }
  0x1b   : > { %166 = vst.msk [vmem:[%s551_s17 + $0x8] sm:$0x1] %vm148_vm0, %v164_v14  ;;  %v249_v55 = vmax.f32 %v429_v51, %v431_v52  ;;  %v237_v57 = vld [vmem:[#allocation2 + $0x11] ss:$2 sm:$0x1]  ;;  %v444_v14 = vld [vmem:[%s538_s13 + $0xe8] sm:$0xff] }
  0x1c   : > { %v435_v63 = vld [vmem:[%s538_s13 + $0xb0] sm:$0xff]  ;;  %v288_v16 = vmax.f32 %v442_v13, %v444_v14 }
  0x1d   : > { %v268_v3 = vmax.f32 %v435_v63, %v437_v0  ;;  %v256_v5 = vld [vmem:[#allocation2 + $0x11] ss:$2 sm:$0x1] }
  0x1e   : > { %v441_v11 = vld [vmem:[%s538_s13 + $0xd0] sm:$0xff] }
  0x1f   : > { %v287_v15 = vmax.f32 %v441_v11, %v443_v12  ;;  %v275_v17 = vld [vmem:[#allocation2 + $0x11] ss:$2 sm:$0x1] }
  0x20   : > { %v177_v22 = vld [vmem:[#allocation2] ss:$2 sm:$0xff]  ;;  %v179_v23 = vld [vmem:[#allocation2 + $0x1] ss:$2 sm:$0xff] }
  0x21   : > { %194 = vst.msk [vmem:[#allocation2 + $0x1] sm:$0xff] %vm153_vm1, %v192_v19  ;;  %v178_v24 = vld [vmem:[#allocation2 + $0x10] ss:$2 sm:$0x1]  ;;  %v181_v25 = vmax.f32 %v177_v22, %v179_v23 }
  0x22   : > { %195 = vst.msk [vmem:[#allocation2 + $0x9] sm:$0xff] %vm153_vm1, %v193_v20  ;;  %v182_v26 = vmax.f32 %v178_v24, %v180_v21  ;;  %v294_v23 = vld [vmem:[#allocation2 + $0x11] ss:$2 sm:$0x1] }
  0x23   : > { %409 = vst.msk [vmem:[%s551_s17 + $0x10] sm:$0xff] %vm153_vm1, %v181_v25  ;;  %v447_v24 = vld [vmem:[%s538_s13 + $0xf0] sm:$0xff]  ;;  %v448_v25 = vld [vmem:[%s538_s13 + $0xf8] sm:$0xff] }
  0x24   : > { %410 = vst.msk [vmem:[%s551_s17 + $0x18] sm:$0x1] %vm148_vm0, %v182_v26 }
  0x29   : > { %v196_v34 = vld [vmem:[#allocation2] ss:$2 sm:$0xff]  ;;  %v197_v35 = vld [vmem:[#allocation2 + $0x10] ss:$2 sm:$0x1] }
  0x2a   : > { %v198_v36 = vld [vmem:[#allocation2 + $0x1] ss:$2 sm:$0xff]  ;;  %v201_v37 = vmax.f32 %v197_v35, %v199_v33 }
  0x2b   : > { %213 = vst.msk [vmem:[#allocation2 + $0x1] sm:$0xff] %vm153_vm1, %v211_v31  ;;  %214 = vst.msk [vmem:[#allocation2 + $0x9] sm:$0xff] %vm153_vm1, %v212_v32  ;;  %v200_v38 = vmax.f32 %v196_v34, %v198_v36  ;;  %v308_v31 = vld [vmem:[#allocation2 + $0x11] ss:$2 sm:$0x1] }
  0x2c   : > { %416 = vst.msk [vmem:[%s551_s17 + $0x28] sm:$0x1] %vm148_vm0, %v201_v37 }
  0x2d   : > { %415 = vst.msk [vmem:[%s551_s17 + $0x20] sm:$0xff] %vm153_vm1, %v200_v38 }
  0x32   : > { %v216_v46 = vld [vmem:[#allocation2 + $0x10] ss:$2 sm:$0x1]  ;;  %v215_v47 = vld [vmem:[#allocation2] ss:$2 sm:$0xff] }
  0x33   : > { %v217_v48 = vld [vmem:[#allocation2 + $0x1] ss:$2 sm:$0xff]  ;;  %v220_v49 = vmax.f32 %v216_v46, %v218_v45 }
  0x34   : > { %232 = vst.msk [vmem:[#allocation2 + $0x1] sm:$0xff] %vm153_vm1, %v230_v43  ;;  %233 = vst.msk [vmem:[#allocation2 + $0x9] sm:$0xff] %vm153_vm1, %v231_v44  ;;  %v219_v50 = vmax.f32 %v215_v47, %v217_v48 }
  0x35   : > { %422 = vst.msk [vmem:[%s551_s17 + $0x38] sm:$0x1] %vm148_vm0, %v220_v49 }
  0x36   : > { %421 = vst.msk [vmem:[%s551_s17 + $0x30] sm:$0xff] %vm153_vm1, %v219_v50 }
  0x3b   : > { %v234_v58 = vld [vmem:[#allocation2] ss:$2 sm:$0xff]  ;;  %v235_v59 = vld [vmem:[#allocation2 + $0x10] ss:$2 sm:$0x1] }
  0x3c   : > { %v236_v60 = vld [vmem:[#allocation2 + $0x1] ss:$2 sm:$0xff]  ;;  %v239_v61 = vmax.f32 %v235_v59, %v237_v57 }
  0x3d   : > { %251 = vst.msk [vmem:[#allocation2 + $0x1] sm:$0xff] %vm153_vm1, %v249_v55  ;;  %252 = vst.msk [vmem:[#allocation2 + $0x9] sm:$0xff] %vm153_vm1, %v250_v56  ;;  %v238_v62 = vmax.f32 %v234_v58, %v236_v60 }
  0x3e   : > { %428 = vst.msk [vmem:[%s551_s17 + $0x48] sm:$0x1] %vm148_vm0, %v239_v61 }
  0x3f   : > { %427 = vst.msk [vmem:[%s551_s17 + $0x40] sm:$0xff] %vm153_vm1, %v238_v62 }
  0x44   : > { %v253_v6 = vld [vmem:[#allocation2] ss:$2 sm:$0xff]  ;;  %v254_v7 = vld [vmem:[#allocation2 + $0x10] ss:$2 sm:$0x1] }
  0x45   : > { %v255_v8 = vld [vmem:[#allocation2 + $0x1] ss:$2 sm:$0xff]  ;;  %v258_v9 = vmax.f32 %v254_v7, %v256_v5 }
  0x46   : > { %270 = vst.msk [vmem:[#allocation2 + $0x1] sm:$0xff] %vm153_vm1, %v268_v3  ;;  %271 = vst.msk [vmem:[#allocation2 + $0x9] sm:$0xff] %vm153_vm1, %v269_v4  ;;  %v257_v10 = vmax.f32 %v253_v6, %v255_v8 }
  0x47   : > { %434 = vst.msk [vmem:[%s551_s17 + $0x58] sm:$0x1] %vm148_vm0, %v258_v9 }
  0x48   : > { %433 = vst.msk [vmem:[%s551_s17 + $0x50] sm:$0xff] %vm153_vm1, %v257_v10 }
  0x4d   : > { %v272_v18 = vld [vmem:[#allocation2] ss:$2 sm:$0xff]  ;;  %v273_v19 = vld [vmem:[#allocation2 + $0x10] ss:$2 sm:$0x1] }
  0x4e   : > { %v274_v20 = vld [vmem:[#allocation2 + $0x1] ss:$2 sm:$0xff]  ;;  %v277_v21 = vmax.f32 %v273_v19, %v275_v17 }
  0x4f   : > { %289 = vst.msk [vmem:[#allocation2 + $0x1] sm:$0xff] %vm153_vm1, %v287_v15  ;;  %290 = vst.msk [vmem:[#allocation2 + $0x9] sm:$0xff] %vm153_vm1, %v288_v16  ;;  %v276_v22 = vmax.f32 %v272_v18, %v274_v20 }
  0x50   : > { %440 = vst.msk [vmem:[%s551_s17 + $0x68] sm:$0x1] %vm148_vm0, %v277_v21 }
  0x51   : > { %439 = vst.msk [vmem:[%s551_s17 + $0x60] sm:$0xff] %vm153_vm1, %v276_v22 }
  0x56   : > { %v291_v26 = vld [vmem:[#allocation2] ss:$2 sm:$0xff]  ;;  %v292_v27 = vld [vmem:[#allocation2 + $0x10] ss:$2 sm:$0x1] }
  0x57   : > { %v293_v28 = vld [vmem:[#allocation2 + $0x1] ss:$2 sm:$0xff]  ;;  %v296_v29 = vmax.f32 %v292_v27, %v294_v23 }
  0x58   : > { %303 = vst.msk [vmem:[#allocation2 + $0x1] sm:$0xff] %vm153_vm1, %v447_v24  ;;  %304 = vst.msk [vmem:[#allocation2 + $0x9] sm:$0xff] %vm153_vm1, %v448_v25  ;;  %v295_v30 = vmax.f32 %v291_v26, %v293_v28 }
  0x59   : > { %446 = vst.msk [vmem:[%s551_s17 + $0x78] sm:$0x1] %vm148_vm0, %v296_v29 }
  0x5a   : > { %445 = vst.msk [vmem:[%s551_s17 + $0x70] sm:$0xff] %vm153_vm1, %v295_v30 }
  0x5f   : > { %v305_v32 = vld [vmem:[#allocation2] ss:$2 sm:$0xff]  ;;  %v307_v33 = vld [vmem:[#allocation2 + $0x1] ss:$2 sm:$0xff] }
  0x60   : > { %v309_v34 = vmax.f32 %v305_v32, %v307_v33  ;;  %v306_v35 = vld [vmem:[#allocation2 + $0x10] ss:$2 sm:$0x1] }
  0x61   : > { %v310_v36 = vmax.f32 %v306_v35, %v308_v31 }
  0x62   : > { %449 = vst.msk [vmem:[%s551_s17 + $0x80] sm:$0xff] %vm153_vm1, %v309_v34 }
  0x63   : > { %450 = vst.msk [vmem:[%s551_s17 + $0x88] sm:$0x1] %vm148_vm0, %v310_v36 }
  0x64 PF: > { %s11_s8 = sadd.s32 1, %s502_s8   ;;  %s642_s6 = smov %s498_s7 }
  0x65   : > { %p8_p5 = scmp.ge.s32.totalorder %s11_s8, 4   ;;  %s643_s7 = smov %s645_s9 }
  0x67   :  { %10 = sbr.rel (!%p8_p5) target bundleno = 2 (0x2), region = 80 }

</bundles_post_ra>
